<compile_context>
chip_gen: v7x
topology: tpu7x:2x2x1
jax: 0.10.0
libtpu: 0.0.40
codegen_flags: <defaults>
</compile_context>

<pallas_src>
import jax
import jax.numpy as jnp
from jax.experimental import pallas as pl
from jax.experimental.pallas import tpu as pltpu


def weight_and_sum_kernel(x_ref, w_ref, b_ref, hsum_ref, aw_ref):
    # x_ref    : (BT, N, D)  node features, BT graphs per grid step (VMEM)
    # w_ref    : (1, D)      Linear(in_feats, 1) weight row          (VMEM)
    # b_ref    : (1, 1)      bias scalar                             (SMEM)
    # hsum_ref : (BT, D)     gated node sum per graph  (lane-dense)
    # aw_ref   : (BT, N)     raw per-node logits       (lane-dense)
    x = x_ref[...].astype(jnp.float32)                       # (BT, N, D)
    w = w_ref[...].astype(jnp.float32)                       # (1, D)
    b = b_ref[0, 0]                                          # scalar from SMEM

    # Per-node logit: elementwise multiply + lane reduction (VPU/XLU),
    # avoiding a width-1 MXU matmul.  N lands on the lane axis of the output.
    logits = jnp.sum(x * w[None, :, :], axis=-1) + b         # (BT, N)
    aw_ref[...] = logits.astype(aw_ref.dtype)

    # Sigmoid gate (EUP) + weighted sum over nodes (sublane reduction).
    gate = jax.nn.sigmoid(logits)                            # (BT, N)
    hsum_ref[...] = jnp.sum(x * gate[:, :, None], axis=1).astype(hsum_ref.dtype)


def weight_and_sum(feats, weight, bias, *, block_graphs=None):
    """feats: [B, N, D], weight: [1, D], bias: [1, 1]
    -> (h_g_sum [B, D], atom_weights [B, N, 1])."""
    B, N, D = feats.shape
    dtype = feats.dtype
    itemsize = jnp.dtype(dtype).itemsize

    # Pad lanes (D -> multiple of 128) and sublanes (N -> multiple of 8).
    D_pad = pl.cdiv(D, 128) * 128
    N_pad = pl.cdiv(N, 8) * 8

    # Graphs per grid step: target ~4 MiB of feats per block so the
    # double-buffered input plus f32 intermediates fit comfortably inside
    # every generation's scoped VMEM (16 MiB v5e / 32 MiB v6e-v7x defaults).
    per_graph_bytes = N_pad * D_pad * itemsize
    if block_graphs is None:
        bt = max(1, (4 << 20) // per_graph_bytes)
        if bt >= B:
            if B >= 16:
                # Split into >= 2 grid steps so both v7x TensorCores get work.
                bt = pl.cdiv(pl.cdiv(B, 2), 8) * 8
            else:
                bt = B
        else:
            bt = max(8, (bt // 8) * 8)   # sublane-align the (BT, D)/(BT, N) stores
    else:
        bt = block_graphs                # caller must keep bt mult-of-8 or == B
    B_pad = pl.cdiv(B, bt) * bt

    if (B_pad, N_pad, D_pad) != (B, N, D):
        feats_p = jnp.pad(feats, ((0, B_pad - B), (0, N_pad - N), (0, D_pad - D)))
    else:
        feats_p = feats
    weight_p = jnp.pad(weight, ((0, 0), (0, D_pad - D))) if D_pad != D else weight
    bias_p = bias.reshape(1, 1).astype(jnp.float32)

    grid = (B_pad // bt,)
    grid_spec = pltpu.PrefetchScalarGridSpec(
        num_scalar_prefetch=0,
        grid=grid,
        in_specs=[
            pl.BlockSpec((bt, N_pad, D_pad), lambda i: (i, 0, 0)),     # feats tile
            pl.BlockSpec((1, D_pad), lambda i: (0, 0)),                # weight row
            pl.BlockSpec(memory_space=pltpu.MemorySpace.SMEM),         # bias scalar
        ],
        out_specs=[
            pl.BlockSpec((bt, D_pad), lambda i: (i, 0)),               # h_g_sum
            pl.BlockSpec((bt, N_pad), lambda i: (i, 0)),               # logits (lane-dense)
        ],
    )

    h_sum_p, aw_p = pl.pallas_call(
        weight_and_sum_kernel,
        out_shape=(
            jax.ShapeDtypeStruct((B_pad, D_pad), dtype),
            jax.ShapeDtypeStruct((B_pad, N_pad), dtype),
        ),
        grid_spec=grid_spec,
        compiler_params=pltpu.CompilerParams(
            dimension_semantics=("parallel",),
            vmem_limit_bytes=32 * 1024 * 1024,
        ),
    )(feats_p, weight_p, bias_p)

    h_g_sum = h_sum_p[:B, :D]
    atom_weights = aw_p[:B, :N][..., None]   # back to the module's [B, N, 1] contract
    return h_g_sum, atom_weights


def weight_and_sum_ref(feats, weight, bias):
    logits = jnp.einsum("bnd,od->bno", feats, weight) + bias[0, 0]   # (B, N, 1)
    sig = jax.nn.sigmoid(logits)
    h_g_sum = jnp.sum(feats * sig, axis=1)                           # (B, D)
    return h_g_sum, logits


if __name__ == "__main__":
    # TODO(synk): DGL's variable-size-graph batching (g.local_scope / sum_nodes)
    # is represented here as a dense [B, N, D] batch; ragged graphs would need a
    # segment-sum variant with scalar-prefetched node offsets.
    B, N, D = 2, 8, 32  # 2 graphs, 8 nodes each, in_feats = 32

    key = jax.random.PRNGKey(0)
    k_feat, k_w, k_b = jax.random.split(key, 3)

    feats = jax.random.normal(k_feat, (B, N, D), dtype=jnp.float32)

    # Deterministic nn.Linear(in_feats, 1)-style init: U(-1/sqrt(D), 1/sqrt(D)).
    bound = 1.0 / (D ** 0.5)
    weight = jax.random.uniform(k_w, (1, D), minval=-bound, maxval=bound, dtype=jnp.float32)
    bias = jax.random.uniform(k_b, (1, 1), minval=-bound, maxval=bound, dtype=jnp.float32)

    h_g_sum, atom_weights = weight_and_sum(feats, weight, bias)
    jax.block_until_ready((h_g_sum, atom_weights))

    h_ref, aw_ref = weight_and_sum_ref(feats, weight, bias)
    assert h_g_sum.shape == (B, D)
    assert atom_weights.shape == (B, N, 1)
    assert jnp.allclose(h_g_sum, h_ref, atol=1e-5, rtol=1e-5)
    assert jnp.allclose(atom_weights, aw_ref, atol=1e-5, rtol=1e-5)

    print("KERNEL_OK")
</pallas_src>

<mosaic_0001>
module attributes {stable_mosaic.version = 11 : i64} {
  func.func @weight_and_sum_kernel(%arg0: i32, %arg1: memref<2x8x128xf32, #tpu.memory_space<vmem>>, %arg2: memref<1x128xf32, #tpu.memory_space<vmem>>, %arg3: memref<1x1xf32, #tpu.memory_space<smem>>, %arg4: memref<2x128xf32, #tpu.memory_space<vmem>>, %arg5: memref<2x8xf32, #tpu.memory_space<vmem>>) attributes {dimension_semantics = [#tpu.dimension_semantics<parallel>], iteration_bounds = array<i64: 1>, scalar_prefetch = 0 : i64, scratch_operands = 0 : i64, tpu.core_type = #tpu.core_type<tc>, window_params = [{transform_indices = @transform_0, window_bounds = array<i64: 2, 8, 128>}, {pipeline_mode = #tpu.pipeline_mode<synchronous>, transform_indices = @transform_1, window_bounds = array<i64: 1, 128>}, {transform_indices = @transform_2, window_bounds = array<i64: 1, 1>}, {transform_indices = @transform_3, window_bounds = array<i64: 2, 128>}, {transform_indices = @transform_4, window_bounds = array<i64: 2, 8>}]} {
    %c0 = arith.constant 0 : index
    %c0_0 = arith.constant 0 : index
    %c0_1 = arith.constant 0 : index
    %0 = vector.load %arg1[%c0, %c0_0, %c0_1] : memref<2x8x128xf32, #tpu.memory_space<vmem>>, vector<2x8x128xf32>
    %c0_2 = arith.constant 0 : index
    %c0_3 = arith.constant 0 : index
    %1 = vector.load %arg2[%c0_2, %c0_3] : memref<1x128xf32, #tpu.memory_space<vmem>>, vector<1x128xf32>
    %c0_4 = arith.constant 0 : index
    %c0_5 = arith.constant 0 : index
    %2 = memref.load %arg3[%c0_4, %c0_5] : memref<1x1xf32, #tpu.memory_space<smem>>
    %3 = vector.shape_cast %1 : vector<1x128xf32> to vector<1x1x128xf32>
    %4 = vector.broadcast %3 : vector<1x1x128xf32> to vector<2x8x128xf32>
    %5 = arith.mulf %0, %4 : vector<2x8x128xf32>
    %cst = arith.constant dense<0.000000e+00> : vector<2x8xf32>
    %6 = vector.multi_reduction <add>, %5, %cst [2] : vector<2x8x128xf32> to vector<2x8xf32>
    %7 = vector.broadcast %2 : f32 to vector<2x8xf32>
    %8 = arith.addf %6, %7 : vector<2x8xf32>
    %c0_6 = arith.constant 0 : index
    %c0_7 = arith.constant 0 : index
    %9 = vector.load %arg5[%c0_6, %c0_7] : memref<2x8xf32, #tpu.memory_space<vmem>>, vector<2x8xf32>
    tpu.vector_store %arg5[%c0_6, %c0_7], %8 {strides = array<i32>} : memref<2x8xf32, #tpu.memory_space<vmem>>, vector<2x8xf32>,
    %10 = arith.negf %8 : vector<2x8xf32>
    %11 = math.exp %10 : vector<2x8xf32>
    %cst_8 = arith.constant 1.000000e+00 : f32
    %12 = vector.broadcast %cst_8 : f32 to vector<2x8xf32>
    %13 = arith.addf %12, %11 : vector<2x8xf32>
    %14 = arith.divf %12, %13 : vector<2x8xf32>
    %15 = vector.shape_cast %14 : vector<2x8xf32> to vector<2x8x1xf32>
    %16 = vector.broadcast %15 : vector<2x8x1xf32> to vector<2x8x128xf32>
    %17 = arith.mulf %0, %16 : vector<2x8x128xf32>
    %cst_9 = arith.constant dense<0.000000e+00> : vector<2x128xf32>
    %18 = vector.multi_reduction <add>, %17, %cst_9 [1] : vector<2x8x128xf32> to vector<2x128xf32>
    %c0_10 = arith.constant 0 : index
    %c0_11 = arith.constant 0 : index
    %19 = vector.load %arg4[%c0_10, %c0_11] : memref<2x128xf32, #tpu.memory_space<vmem>>, vector<2x128xf32>
    tpu.vector_store %arg4[%c0_10, %c0_11], %18 {strides = array<i32>} : memref<2x128xf32, #tpu.memory_space<vmem>>, vector<2x128xf32>,
    return
  }
  func.func @transform_0(%arg0: i32) -> (i32, i32, i32) {
    %c0_i32 = arith.constant 0 : i32
    %c0_i32_0 = arith.constant 0 : i32
    %c0_i32_1 = arith.constant 0 : i32
    return %arg0, %c0_i32, %c0_i32_0 : i32, i32, i32
  }
  func.func @transform_1(%arg0: i32) -> (i32, i32) {
    %c0_i32 = arith.constant 0 : i32
    %c0_i32_0 = arith.constant 0 : i32
    %c0_i32_1 = arith.constant 0 : i32
    return %c0_i32, %c0_i32_0 : i32, i32
  }
  func.func @transform_2(%arg0: i32) -> (i32, i32) {
    %c0_i32 = arith.constant 0 : i32
    %c0_i32_0 = arith.constant 0 : i32
    %c0_i32_1 = arith.constant 0 : i32
    return %c0_i32, %c0_i32_0 : i32, i32
  }
  func.func @transform_3(%arg0: i32) -> (i32, i32) {
    %c0_i32 = arith.constant 0 : i32
    %c0_i32_0 = arith.constant 0 : i32
    return %arg0, %c0_i32 : i32, i32
  }
  func.func @transform_4(%arg0: i32) -> (i32, i32) {
    %c0_i32 = arith.constant 0 : i32
    %c0_i32_0 = arith.constant 0 : i32
    return %arg0, %c0_i32 : i32, i32
  }
}

</mosaic_0001>

<bundles_post_ra>
// kernel: tpu_custom_call.1
= control target key start
LH: loop header
LB: loop body
LE: loop exit
PB: predicated region body
PF: predicated region fallthrough
CT: control target
= control target key end

     0   :  { %11 = vsyncpa [#allocation4], 0  ;;  %s291_s0 = inlined_call_operand.hbm [shape: f32[2,8,128], index: 0, kind: input, shape index: {}]   ;;  %s292_s1 = inlined_call_operand.vmem [shape: f32[1,128], index: 1, kind: input, shape index: {}]   ;;  %s293_s2 = inlined_call_operand.<no memory space> [shape: f32[1,1], index: 2, kind: input, shape index: {}]   ;;  %s294_s3 = inlined_call_operand.hbm [shape: f32[2,128], index: 3, kind: output, shape index: {0}]   ;;  %s295_s4 = inlined_call_operand.hbm [shape: f32[2,8], index: 4, kind: output, shape index: {1}]  }
   0x1   :  { %12 = vsyncpa [#allocation5], 0 }
   0x2   :  { %13 = vsyncpa [#allocation8], 0  ;;  %s217_s15 = smov [#allocation3]   ;;  %s145_s19 = scalar_lea.hbm %s291_s0, 256 }
   0x3   :  { %s19_s16 = sshll.u32 %s217_s15, 4  ;;  %p146_p0 = scmp.ne.s32.totalorder %s291_s0, %s145_s19  ;;  %s20_s16 = int_to_ptr.vmem [resolvable:$true] %s19_s16 }
   0x4   :  { %p149_p1 = scmp.lt.u32.totalorder %s145_s19, %s291_s0 }
   0x6   :  { %p151_p2 = pnand %p149_p1, %p146_p0 }
   0x8   :  { %154 = shalt.err (!%p151_p2)
}
   0x9   :  { %s155_s24 = scalar_lea.vmem %s20_s16, 256  ;;  %p160_p4 = scmp.lt.s32.totalorder %s20_s16, %s20_s16 }
   0xa   :  { %p156_p3 = scmp.ne.s32.totalorder %s20_s16, %s155_s24  ;;  %p161_p5 = scmp.lt.s32.totalorder %s155_s24, %s155_s24 }
   0xc   :  { %p162_p6 = por %p161_p5, %p160_p4 }
   0xe   :  { %p163_p7 = pnand %p162_p6, %p156_p3 }
  0x10   :  { %166 = shalt.err (!%p163_p7)
}
  0x11   :  { %s218_s25 = smov 128   ;;  %s219_s26 = smov 8  }
  0x12   :  { %25 = dma.hbm_to_vmem [thread:$0]  %s291_s0, 256, %s20_s16, [#allocation4], %s218_s25, %s218_s25, %s219_s26  }
  0x13   :  { %211 = dma.done.wait [#allocation4], 256  }
  0x14   :  { %212 = vsyncadd [#allocation4], 4294967040  ;;  %v33_v0 = vld [vmem:[#allocation3] sm:$0xff]  ;;  %v34_v2 = vld [vmem:[#allocation3 + $0x8] sm:$0xff]  ;;  %v54_v5 = vlaneseq  ;;  %v49_v6 = vstv %s293_s2  ;;  %s220_s0 = smov [#allocation7]   ;;  %vm64_vm0 = vcmask 1041409  }
  0x15   :  { %v129_v1 = vld [vmem:[%s292_s1] ss:$0 sm:$0xff]  ;;  %s116_s1 = sshll.u32 %s220_s0, 4  ;;  %vm67_vm1 = vcmask 58368   ;;  %s117_s1 = int_to_ptr.vmem [resolvable:$true] %s116_s1 }
  0x16   :  { %v43_v3 = vmul.f32 %v129_v1, %v33_v0  ;;  %v44_v4 = vmul.f32 %v129_v1, %v34_v2  ;;  %v55_v7 = vand.u32 127, %v54_v5  ;;  %v57_v8 = vshrl.u32 %v54_v5, 7  ;;  %s167_s2 = scalar_lea.vmem %s117_s1, 32  ;;  %p172_p9 = scmp.lt.s32.totalorder %s117_s1, %s117_s1 }
  0x17   :  { %p168_p8 = scmp.ne.s32.totalorder %s117_s1, %s167_s2  ;;  %p173_p10 = scmp.lt.s32.totalorder %s167_s2, %s167_s2 }
  0x18   :  { %45 = vadd.xlane.f32.xlu0 %v43_v3  ;;  %v58_v11 = vsub.s32 %v55_v7, %v57_v8 }
  0x19   :  { %p174_p11 = por %p173_p10, %p172_p9 }
  0x1b   :  { %p175_p12 = pnand %p174_p11, %p168_p8 }
  0x1c   :  { %47 = vadd.xlane.f32.xlu0 %v44_v4 }
  0xa5   :  { %v46_v9 = vpop.xlane.xlu0 %45 }
  0xa6   :  { %v50_v10 = vadd.f32 %v49_v6, %v46_v9 }
  0xa8   :  { %v130_v12 = vmul.f32 -1.442695, %v50_v10  ;;  %v59_v15 = vrot.slane %v50_v10, %v58_v11 }
  0xa9   :  { %v48_v13 = vpop.xlane.xlu0 %47 }
  0xaa   :  { %137 = vpow2.f32 %v130_v12  ;;  %v51_v14 = vadd.f32 %v49_v6, %v48_v13 }
  0xac   :  { %v63_v16 = vrot.slane %v51_v14, %v58_v11  ;;  %v131_v17 = vmul.f32 -1.442695, %v51_v14 }
  0xae   :  { %139 = vpow2.f32 %v131_v17  ;;  %v65_v18 = vsel %vm64_vm0, %v63_v16, %v59_v15 }
  0xaf   :  { %68 = vst.msk [vmem:[#allocation7] sm:$0x3] %vm67_vm1, %v65_v18 }
  0xb0   :  { %178 = shalt.err (!%p175_p12)
}
  0xb1   :  { %s179_s9 = scalar_lea.hbm %s295_s4, 32 }
  0xb2   :  { %p180_p13 = scmp.ne.s32.totalorder %s295_s4, %s179_s9  ;;  %p183_p0 = scmp.lt.u32.totalorder %s179_s9, %s295_s4 }
  0xb4   :  { %p185_p1 = pnand %p183_p0, %p180_p13 }
  0xb6   :  { %188 = shalt.err (!%p185_p1)
}
  0xb7   :  { %119 = dma.vmem_to_hbm [thread:$0]  %s117_s1, 32, %s295_s4, [#allocation8]   ;;  %v138_v19 = vpop.eup %137 }
  0xb8   :  { %v75_v20 = vadd.f32 1.0, %v138_v19  ;;  %v140_v21 = vpop.eup %139  ;;  %s221_s4 = smov [#allocation6]  }
  0xb9   :  { %v76_v22 = vadd.f32 1.0, %v140_v21  ;;  %s106_s16 = sshll.u32 %s221_s4, 4  ;;  %s107_s16 = int_to_ptr.vmem [resolvable:$true] %s106_s16 }
  0xba   :  { %141 = vrcp.f32 %v75_v20  ;;  %s189_s17 = scalar_lea.vmem %s107_s16, 32  ;;  %p194_p3 = scmp.lt.s32.totalorder %s107_s16, %s107_s16 }
  0xbb   :  { %143 = vrcp.f32 %v76_v22  ;;  %p190_p2 = scmp.ne.s32.totalorder %s107_s16, %s189_s17  ;;  %p195_p4 = scmp.lt.s32.totalorder %s189_s17, %s189_s17 }
  0xbd   :  { %p196_p5 = por %p195_p4, %p194_p3 }
  0xbf   :  { %p197_p6 = pnand %p196_p5, %p190_p2 }
  0xc4   :  { %v142_v23 = vpop.eup %141 }
  0xc5   :  { %v81_v24 = vmul.f32 %v142_v23, %v33_v0  ;;  %v144_v26 = vpop.eup %143 }
  0xc6   :  { %v82_v27 = vmul.f32 %v144_v26, %v34_v2 }
  0xc7   :  { %v83_v25 = vrot.slane %v81_v24, 4 }
  0xc8   :  { %v89_v30 = vrot.slane %v82_v27, 4 }
  0xc9   :  { %v84_v28 = vadd.f32 %v83_v25, %v81_v24 }
  0xca   :  { %v90_v32 = vadd.f32 %v89_v30, %v82_v27 }
  0xcb   :  { %v85_v29 = vrot.slane %v84_v28, 2 }
  0xcc   :  { %v91_v33 = vrot.slane %v90_v32, 2 }
  0xcd   :  { %v86_v31 = vadd.f32 %v85_v29, %v84_v28 }
  0xce   :  { %v92_v35 = vadd.f32 %v91_v33, %v90_v32 }
  0xcf   :  { %v87_v34 = vrot.slane %v86_v31, 1 }
  0xd0   :  { %v93_v36 = vrot.slane %v92_v35, 1 }
  0xd1   :  { %v88_v37 = vadd.f32 %v87_v34, %v86_v31 }
  0xd2   :  { %v94_v38 = vadd.f32 %v93_v36, %v92_v35 }
  0xd4   :  { %v97_v39 = vsel %vm64_vm0, %v94_v38, %v88_v37 }
  0xd5   :  { %99 = vst [vmem:[#allocation6] sm:$0x3] %v97_v39 }
  0xd6   :  { %200 = shalt.err (!%p197_p6)
}
  0xd7   :  { %s201_s20 = scalar_lea.hbm %s294_s3, 32 }
  0xd8   :  { %p202_p7 = scmp.ne.s32.totalorder %s294_s3, %s201_s20  ;;  %p205_p8 = scmp.lt.u32.totalorder %s201_s20, %s294_s3 }
  0xda   :  { %p207_p9 = pnand %p205_p8, %p202_p7 }
  0xdc   :  { %210 = shalt.err (!%p207_p9)
}
  0xdd   :  { %109 = dma.vmem_to_hbm [thread:$0]  %s107_s16, 32, %s294_s3, [#allocation5]  }
  0xde   :  { %213 = dma.done.wait [#allocation5], 32  }
  0xdf   :  { %214 = vsyncadd [#allocation5], 4294967264 }
  0xe0   :  { %215 = dma.done.wait [#allocation8], 32  }
  0xe1   :  { %216 = vsyncadd [#allocation8], 4294967264 }
  0xe2   :  { %126 = vsyncpa [#allocation4], 1 }
  0xe3   :  { %127 = vsyncpa [#allocation5], 1 }
  0xe4   :  { %128 = vsyncpa [#allocation8], 1 }

</bundles_post_ra>
